<compile_context>
chip_gen: v5e
topology: v5e:2x2
jax: 0.10.0
libtpu: 0.0.40
codegen_flags: <defaults>
</compile_context>

<pallas_src>
import functools

import jax
import jax.numpy as jnp
from jax import lax
from jax.experimental import pallas as pl
from jax.experimental.pallas import tpu as pltpu

TEMPERATURE = 0.07
BASE_TEMPERATURE = 0.07


def _round_up(x, m):
    return ((x + m - 1) // m) * m


def _supcon_kernel(lab_col_ref, lab_row_ref, feat_ref, loss_ref, *,
                   inv_temp, scale, tm, n_valid):
    """One anchor-row tile of the SupCon ('all' mode) forward.

    lab_col_ref: [TM, 1]      int32 labels of this tile's anchor rows
    lab_row_ref: [1, N_pad]   int32 labels of all contrast columns (resident)
    feat_ref:    [N_pad, D]   contrast features (bf16 or f32), VMEM-resident
    loss_ref:    [TM, 1]      per-anchor-row loss output for this tile
    """
    i0 = pl.multiple_of(pl.program_id(0) * tm, tm)

    f_all = feat_ref[...]                       # [N_pad, D]
    f_tile = feat_ref[pl.ds(i0, tm), :]         # [TM,  D] aligned slice of resident VMEM
    n_pad = f_all.shape[0]

    # logits = (F_tile @ F_all^T) * (1/temperature)   -- MXU, f32 accumulate.
    logits = lax.dot_general(
        f_tile, f_all,
        dimension_numbers=(((1,), (1,)), ((), ())),
        preferred_element_type=jnp.float32) * inv_temp          # [TM, N_pad]

    # Row-max subtraction (numerical stability; exactly cancels in the loss).
    logits = logits - jnp.max(logits, axis=1, keepdims=True)

    # Masks built in-kernel (no N x N arrays shipped from HBM):
    #   keep: valid (un-padded) column AND not the self-pair (diagonal)
    #   pos : same-class pair AND keep
    row_ids = lax.broadcasted_iota(jnp.int32, (tm, 1), 0) + i0   # global row idx
    col_ids = lax.broadcasted_iota(jnp.int32, (1, n_pad), 1)     # global col idx
    keep = jnp.logical_and(row_ids != col_ids, col_ids < n_valid)  # [TM, N_pad]

    lab_r = lab_col_ref[...]                                     # [TM, 1]
    lab_c = lab_row_ref[...]                                     # [1, N_pad]
    pos = jnp.logical_and(lab_r == lab_c, keep).astype(jnp.float32)

    # Fused log-prob:
    #   sum(mask * log_prob) = sum(mask*logits) - log(denom) * sum(mask)
    exp_l = jnp.where(keep, jnp.exp(logits), 0.0)
    denom = jnp.sum(exp_l, axis=1, keepdims=True)                # [TM, 1]
    s_m = jnp.sum(pos, axis=1, keepdims=True)                    # [TM, 1]
    s_ml = jnp.sum(pos * logits, axis=1, keepdims=True)          # [TM, 1]

    s_m_safe = jnp.where(s_m < 1e-6, 1.0, s_m)
    mean_log_prob_pos = (s_ml - jnp.log(denom) * s_m) / s_m_safe
    loss_ref[...] = (-scale) * mean_log_prob_pos


def supcon_loss(features, labels=None, mask=None,
                temperature=TEMPERATURE, base_temperature=BASE_TEMPERATURE,
                contrast_mode="all", compute_dtype=jnp.bfloat16, tm_max=128):
    """features: [bsz, n_views, ...]; labels: [bsz] int; mask unsupported (TODO)."""
    if features.ndim < 3:
        raise ValueError("`features` needs to be [bsz, n_views, ...]")
    if features.ndim > 3:
        features = features.reshape(features.shape[0], features.shape[1], -1)
    if contrast_mode != "all":
        # TODO(synk): contrast_mode='one' (single-anchor-view) path not implemented.
        raise NotImplementedError("only contrast_mode='all' is implemented")

    bsz, n_views, dim = features.shape

    if labels is not None and mask is not None:
        raise ValueError("Cannot define both `labels` and `mask`")
    if mask is not None:
        # TODO(synk): arbitrary user-supplied [bsz,bsz] mask path not implemented
        # in-kernel (would need an in-kernel gather of the base mask).
        raise NotImplementedError("explicit `mask` argument not supported")
    if labels is None:
        labels_flat = jnp.arange(bsz, dtype=jnp.int32)       # SimCLR: eye mask
    else:
        labels_flat = jnp.asarray(labels).reshape(-1).astype(jnp.int32)
        if labels_flat.shape[0] != bsz:
            raise ValueError("Num of labels does not match num of features")

    n = bsz * n_views
    # Adaptive row tile: small batches use a single tile rounded up to the
    # sublane quantum (8) instead of padding all the way to 128; large batches
    # use 128-row tiles.
    if n <= tm_max:
        tm = max(8, _round_up(n, 8))
    else:
        tm = tm_max
    n_pad = _round_up(n, tm)
    num_tiles = n_pad // tm

    # torch.cat(torch.unbind(features, dim=1), dim=0): views-major concatenation.
    cf = jnp.transpose(features, (1, 0, 2)).reshape(n, dim).astype(compute_dtype)
    cf = jnp.pad(cf, ((0, n_pad - n), (0, 0)))
    lab_all = jnp.tile(labels_flat, (n_views,))
    lab_all = jnp.pad(lab_all, (0, n_pad - n), constant_values=-1)
    lab_row = lab_all.reshape(1, n_pad)
    lab_col = lab_all.reshape(n_pad, 1)

    kernel = functools.partial(
        _supcon_kernel,
        inv_temp=1.0 / float(temperature),
        scale=float(temperature) / float(base_temperature),
        tm=tm, n_valid=n)

    # VMEM budget: resident features (+pipeline copy), label vectors, the
    # TM x N_pad f32 logits/exp/mask temporaries, plus generous slack; capped at
    # 48 MiB so the same config also fits v7x's 64 MiB VMEM.
    feat_bytes = n_pad * max(dim, 128) * jnp.dtype(compute_dtype).itemsize
    vmem_limit = int(min(
        2 * feat_bytes + 8 * n_pad * 4 + 8 * tm * max(n_pad, 128) * 4 + (8 << 20),
        48 << 20))

    out = pl.pallas_call(
        kernel,
        out_shape=jax.ShapeDtypeStruct((n_pad, 1), jnp.float32),
        grid=(num_tiles,),
        in_specs=[
            pl.BlockSpec((tm, 1), lambda i: (i, 0)),        # anchor-row labels (tiled)
            pl.BlockSpec((1, n_pad), lambda i: (0, 0)),     # contrast labels (resident)
            pl.BlockSpec((n_pad, dim), lambda i: (0, 0)),   # features (resident)
        ],
        out_specs=pl.BlockSpec((tm, 1), lambda i: (i, 0)),  # per-anchor losses
        compiler_params=pltpu.CompilerParams(
            dimension_semantics=("parallel",),
            vmem_limit_bytes=vmem_limit),
    )(lab_col, lab_row, cf)

    # loss.view(anchor_count, batch_size).mean() == mean over the N valid rows.
    return jnp.mean(out[:n, 0])


def _supcon_loss_ref(features, labels=None, temperature=TEMPERATURE,
                     base_temperature=BASE_TEMPERATURE):
    """Pure-JAX reference mirroring the PyTorch forward (contrast_mode='all')."""
    bsz, n_views, dim = features.shape
    if labels is None:
        base_mask = jnp.eye(bsz, dtype=jnp.float32)
    else:
        labels = labels.reshape(-1, 1)
        base_mask = (labels == labels.T).astype(jnp.float32)
    cf = jnp.transpose(features, (1, 0, 2)).reshape(n_views * bsz, dim)
    logits = jnp.dot(cf, cf.T) / temperature
    logits = logits - jnp.max(logits, axis=1, keepdims=True)
    mask = jnp.tile(base_mask, (n_views, n_views))
    nn = n_views * bsz
    logits_mask = 1.0 - jnp.eye(nn, dtype=jnp.float32)
    mask = mask * logits_mask
    exp_logits = jnp.exp(logits) * logits_mask
    log_prob = logits - jnp.log(exp_logits.sum(1, keepdims=True))
    mpp = mask.sum(1)
    mpp = jnp.where(mpp < 1e-6, jnp.ones_like(mpp), mpp)
    mean_log_prob_pos = (mask * log_prob).sum(1) / mpp
    loss = -(temperature / base_temperature) * mean_log_prob_pos
    return loss.reshape(n_views, bsz).mean()


if __name__ == "__main__":
    key = jax.random.PRNGKey(0)
    k_feat, k_lab, k_feat2, k_lab2 = jax.random.split(key, 4)

    # --- Small case: single adaptive tile (N = 16 -> TM = 16) ------------------
    bsz, n_views, dim = 8, 2, 32
    feats = jax.random.normal(k_feat, (bsz, n_views, dim), dtype=jnp.float32)
    feats = feats / jnp.linalg.norm(feats, axis=-1, keepdims=True)  # SupCon uses L2-normed features
    labels = jax.random.randint(k_lab, (bsz,), 0, 4)

    ref = _supcon_loss_ref(feats, labels)

    # f32 compute path: tight check against the reference forward.
    loss_f32 = supcon_loss(feats, labels=labels, compute_dtype=jnp.float32)
    jax.block_until_ready(loss_f32)
    assert jnp.allclose(loss_f32, ref, atol=1e-4, rtol=1e-4), (loss_f32, ref)

    # Default bf16-MXU path: looser tolerance (bf16 matmul inputs, f32 accumulate).
    loss_bf16 = supcon_loss(feats, labels=labels)
    jax.block_until_ready(loss_bf16)
    assert jnp.allclose(loss_bf16, ref, atol=5e-2, rtol=5e-2), (loss_bf16, ref)

    # SimCLR degenerate case (labels=None -> eye mask).
    ref_simclr = _supcon_loss_ref(feats, None)
    loss_simclr = supcon_loss(feats)
    jax.block_until_ready(loss_simclr)
    assert jnp.allclose(loss_simclr, ref_simclr, atol=5e-2, rtol=5e-2), (
        loss_simclr, ref_simclr)

    # --- Larger case: multi-tile grid + column padding (N = 144 -> 2 tiles) ----
    bsz2, n_views2, dim2 = 72, 2, 64
    feats2 = jax.random.normal(k_feat2, (bsz2, n_views2, dim2), dtype=jnp.float32)
    feats2 = feats2 / jnp.linalg.norm(feats2, axis=-1, keepdims=True)
    labels2 = jax.random.randint(k_lab2, (bsz2,), 0, 7)

    ref2 = _supcon_loss_ref(feats2, labels2)
    loss2_f32 = supcon_loss(feats2, labels=labels2, compute_dtype=jnp.float32)
    jax.block_until_ready(loss2_f32)
    assert jnp.allclose(loss2_f32, ref2, atol=1e-3, rtol=1e-4), (loss2_f32, ref2)

    loss2_bf16 = supcon_loss(feats2, labels=labels2)
    jax.block_until_ready(loss2_bf16)
    assert jnp.allclose(loss2_bf16, ref2, atol=5e-2, rtol=5e-2), (loss2_bf16, ref2)

    print("KERNEL_OK")
</pallas_src>

<mosaic_0001>
module attributes {stable_mosaic.version = 11 : i64} {
  func.func @_supcon_kernel(%arg0: i32, %arg1: memref<16x1xi32, #tpu.memory_space<vmem>>, %arg2: memref<1x16xi32, #tpu.memory_space<vmem>>, %arg3: memref<16x32xf32, #tpu.memory_space<vmem>>, %arg4: memref<16x1xf32, #tpu.memory_space<vmem>>) attributes {dimension_semantics = [#tpu.dimension_semantics<parallel>], iteration_bounds = array<i64: 1>, scalar_prefetch = 0 : i64, scratch_operands = 0 : i64, tpu.core_type = #tpu.core_type<tc>, window_params = [{transform_indices = @transform_0, window_bounds = array<i64: 16, 1>}, {pipeline_mode = #tpu.pipeline_mode<synchronous>, transform_indices = @transform_1, window_bounds = array<i64: 1, 16>}, {pipeline_mode = #tpu.pipeline_mode<synchronous>, transform_indices = @transform_2, window_bounds = array<i64: 16, 32>}, {transform_indices = @transform_3, window_bounds = array<i64: 16, 1>}]} {
    %c16_i32 = arith.constant 16 : i32
    %0 = arith.muli %arg0, %c16_i32 : i32
    %1 = tpu.assume_multiple %0, 16 : i32
    %c0 = arith.constant 0 : index
    %c0_0 = arith.constant 0 : index
    %2 = vector.load %arg3[%c0, %c0_0] : memref<16x32xf32, #tpu.memory_space<vmem>>, vector<16x32xf32>
    %3 = arith.index_cast %1 : i32 to index
    %c0_1 = arith.constant 0 : index
    %4 = vector.load %arg3[%3, %c0_1] : memref<16x32xf32, #tpu.memory_space<vmem>>, vector<16x32xf32>
    %cst = arith.constant dense<0.000000e+00> : vector<16x16xf32>
    %5 = tpu.matmul %4, %2, %cst {dimension_numbers = #tpu.dot_dimension_numbers<[1], [1], [0], [0], [0, 0, 1, 0], [], []>} : vector<16x32xf32>, vector<16x32xf32>, vector<16x16xf32> -> vector<16x16xf32>
    %cst_2 = arith.constant 14.2857141 : f32
    %6 = vector.broadcast %cst_2 : f32 to vector<16x16xf32>
    %7 = arith.mulf %5, %6 : vector<16x16xf32>
    %cst_3 = arith.constant dense<0xFF800000> : vector<16xf32>
    %8 = vector.multi_reduction <maximumf>, %7, %cst_3 [1] : vector<16x16xf32> to vector<16xf32>
    %9 = vector.shape_cast %8 : vector<16xf32> to vector<16x1xf32>
    %10 = vector.broadcast %9 : vector<16x1xf32> to vector<16x16xf32>
    %11 = arith.subf %7, %10 : vector<16x16xf32>
    %12 = tpu.iota {dimensions = array<i32: 0>} : vector<16x1xi32>
    %13 = vector.broadcast %1 : i32 to vector<16x1xi32>
    %14 = arith.addi %12, %13 : vector<16x1xi32>
    %15 = tpu.iota {dimensions = array<i32: 1>} : vector<1x16xi32>
    %16 = vector.broadcast %14 : vector<16x1xi32> to vector<16x16xi32>
    %17 = vector.broadcast %15 : vector<1x16xi32> to vector<16x16xi32>
    %18 = arith.cmpi ne, %16, %17 : vector<16x16xi32>
    %c16_i32_4 = arith.constant 16 : i32
    %19 = vector.broadcast %c16_i32_4 : i32 to vector<1x16xi32>
    %20 = arith.cmpi slt, %15, %19 : vector<1x16xi32>
    %21 = vector.broadcast %20 : vector<1x16xi1> to vector<16x16xi1>
    %22 = arith.andi %18, %21 : vector<16x16xi1>
    %c0_5 = arith.constant 0 : index
    %c0_6 = arith.constant 0 : index
    %23 = vector.load %arg1[%c0_5, %c0_6] : memref<16x1xi32, #tpu.memory_space<vmem>>, vector<16x1xi32>
    %c0_7 = arith.constant 0 : index
    %c0_8 = arith.constant 0 : index
    %24 = vector.load %arg2[%c0_7, %c0_8] : memref<1x16xi32, #tpu.memory_space<vmem>>, vector<1x16xi32>
    %25 = vector.broadcast %23 : vector<16x1xi32> to vector<16x16xi32>
    %26 = vector.broadcast %24 : vector<1x16xi32> to vector<16x16xi32>
    %27 = arith.cmpi eq, %25, %26 : vector<16x16xi32>
    %28 = arith.andi %27, %22 : vector<16x16xi1>
    %29 = arith.extui %28 : vector<16x16xi1> to vector<16x16xi32>
    %30 = arith.sitofp %29 : vector<16x16xi32> to vector<16x16xf32>
    %31 = math.exp %11 : vector<16x16xf32>
    %cst_9 = arith.constant 0.000000e+00 : f32
    %32 = vector.broadcast %cst_9 : f32 to vector<16x16xf32>
    %33 = arith.select %22, %31, %32 : vector<16x16xi1>, vector<16x16xf32>
    %cst_10 = arith.constant dense<0.000000e+00> : vector<16xf32>
    %34 = vector.multi_reduction <add>, %33, %cst_10 [1] : vector<16x16xf32> to vector<16xf32>
    %35 = vector.shape_cast %34 : vector<16xf32> to vector<16x1xf32>
    %cst_11 = arith.constant dense<0.000000e+00> : vector<16xf32>
    %36 = vector.multi_reduction <add>, %30, %cst_11 [1] : vector<16x16xf32> to vector<16xf32>
    %37 = vector.shape_cast %36 : vector<16xf32> to vector<16x1xf32>
    %38 = arith.mulf %30, %11 : vector<16x16xf32>
    %cst_12 = arith.constant dense<0.000000e+00> : vector<16xf32>
    %39 = vector.multi_reduction <add>, %38, %cst_12 [1] : vector<16x16xf32> to vector<16xf32>
    %40 = vector.shape_cast %39 : vector<16xf32> to vector<16x1xf32>
    %cst_13 = arith.constant 9.99999997E-7 : f32
    %41 = vector.broadcast %cst_13 : f32 to vector<16x1xf32>
    %42 = arith.cmpf olt, %37, %41 : vector<16x1xf32>
    %cst_14 = arith.constant 1.000000e+00 : f32
    %43 = vector.broadcast %cst_14 : f32 to vector<16x1xf32>
    %44 = arith.select %42, %43, %37 : vector<16x1xi1>, vector<16x1xf32>
    %45 = math.log %35 : vector<16x1xf32>
    %46 = arith.mulf %45, %37 : vector<16x1xf32>
    %47 = arith.subf %40, %46 : vector<16x1xf32>
    %48 = arith.divf %47, %44 : vector<16x1xf32>
    %cst_15 = arith.constant -1.000000e+00 : f32
    %49 = vector.broadcast %cst_15 : f32 to vector<16x1xf32>
    %50 = arith.mulf %49, %48 : vector<16x1xf32>
    %c0_16 = arith.constant 0 : index
    %c0_17 = arith.constant 0 : index
    %51 = vector.load %arg4[%c0_16, %c0_17] : memref<16x1xf32, #tpu.memory_space<vmem>>, vector<16x1xf32>
    tpu.vector_store %arg4[%c0_16, %c0_17], %50 {strides = array<i32>} : memref<16x1xf32, #tpu.memory_space<vmem>>, vector<16x1xf32>,
    return
  }
  func.func @transform_0(%arg0: i32) -> (i32, i32) {
    %c0_i32 = arith.constant 0 : i32
    %c0_i32_0 = arith.constant 0 : i32
    return %arg0, %c0_i32 : i32, i32
  }
  func.func @transform_1(%arg0: i32) -> (i32, i32) {
    %c0_i32 = arith.constant 0 : i32
    %c0_i32_0 = arith.constant 0 : i32
    %c0_i32_1 = arith.constant 0 : i32
    return %c0_i32, %c0_i32_0 : i32, i32
  }
  func.func @transform_2(%arg0: i32) -> (i32, i32) {
    %c0_i32 = arith.constant 0 : i32
    %c0_i32_0 = arith.constant 0 : i32
    %c0_i32_1 = arith.constant 0 : i32
    return %c0_i32, %c0_i32_0 : i32, i32
  }
  func.func @transform_3(%arg0: i32) -> (i32, i32) {
    %c0_i32 = arith.constant 0 : i32
    %c0_i32_0 = arith.constant 0 : i32
    return %arg0, %c0_i32 : i32, i32
  }
}

</mosaic_0001>

<bundles_post_ra>
// kernel: tpu_custom_call.1
= control target key start
LH: loop header
LB: loop body
LE: loop exit
PB: predicated region body
PF: predicated region fallthrough
CT: control target
= control target key end

     0   :  { %vm20_vm0 = vcmask 261120   ;;  %v202_v1 = vmov 0   ;;  %v67_v5 = vlaneseq  ;;  %vm58_vm6 = vcmask 130048   ;;  %s269_s2 = inlined_call_operand.vmem [shape: f32[16,32], index: 2, kind: input, shape index: {}]   ;;  %s270_s0 = inlined_call_operand.vmem [shape: s32[16,1], index: 0, kind: input, shape index: {}]   ;;  %s271_s1 = inlined_call_operand.vmem [shape: s32[1,16], index: 1, kind: input, shape index: {}]   ;;  %s272_s3 = inlined_call_operand.vmem [shape: f32[16,1], index: 3, kind: output, shape index: {}]  }
   0x1   :  { %v16_v0 = vld [vmem:[%s269_s2 + $0x8] sm:$0xff]  ;;  %187 = vset.pattern.permute.xlu1 %v202_v1  ;;  %v82_v2 = vld [vmem:[%s270_s0] sm:$0xff]  ;;  %188 = vset.pattern.permute.xlu0 %v202_v1  ;;  %v203_v12 = vmov 0.0  }
   0x2   :  { %177 = vmatpush.xpose.msk.msra.mxu0 %vm20_vm0, %v16_v0  ;;  %183 = vmatpush.xpose.msk.msra.mxu1 %vm20_vm0, %v16_v0  ;;  %v15_v3 = vld [vmem:[%s269_s2] sm:$0xff]  ;;  %v83_v4 = vld [vmem:[%s270_s0 + $0x8] sm:$0xff]  ;;  %v68_v7 = vshrl.u32 %v67_v5, 7  ;;  %v74_v8 = vand.u32 127, %v67_v5 }
   0x3   :  { %86 = vperm.xlu1 %187, %v82_v2   ;;  %v189_v6 = vld [vmem:[%s271_s1] ss:$0 sm:$0xff] }
   0x4   :  { %vm75_vm1 = vcmp.ne.s32.totalorder %v68_v7, %v74_v8  ;;  %vm77_vm2 = vcmp.lt.s32.totalorder %v74_v8, 16  ;;  %v69_v10 = vadd.s32 8, %v68_v7 }
   0x5   :  { %vm239_vm4 = vmand %vm75_vm1, %vm77_vm2 }
   0x6   :  { %178 = vmatpush.xpose.msk.msra.mxu0 %vm20_vm0, %v15_v3  ;;  %184 = vmatpush.xpose.msk.msra.mxu1 %vm20_vm0, %v15_v3  ;;  %vm76_vm7 = vcmp.ne.s32.totalorder %v69_v10, %v74_v8 }
   0x7   :  { %vm246_vm8 = vmand %vm76_vm7, %vm77_vm2 }
   0x9   :  { %179 = vmatmul.msk.f32.vlgmr.msra.gmra.mxu0 %vm20_vm0, %v15_v3  ;;  %180 = vmatmul.msk.f32.vlgmr.msra.gmra.mxu1 %vm20_vm0, %v16_v0 }
   0xb   :  { %89 = vperm.xlu1 %187, %v83_v4  }
  0x75   :  { %v87_v9 = vpop.permute.xlu1 %86 }
  0x76   :  { %vm92_vm3 = vcmp.eq.s32.totalorder %v87_v9, %v189_v6 }
  0x77   :  { %vm94_vm5 = vmand %vm92_vm3, %vm239_vm4 }
  0x78   :  { %v181_v13 = vsel %vm94_vm5, 1.0, %v203_v12 }
  0x79   :  { %v112_v14 = vsel %vm58_vm6, %v181_v13, 0.0 }
  0x7a   :  { %113 = vadd.xlane.f32.xlu2 %v112_v14 }
  0x7d   :  { %v90_v16 = vpop.permute.xlu1 %89 }
  0x7e   :  { %vm93_vm9 = vcmp.eq.s32.totalorder %v90_v16, %v189_v6 }
  0x7f   :  { %vm95_vm10 = vmand %vm93_vm9, %vm246_vm8 }
  0x80   :  { %v182_v17 = vsel %vm95_vm10, 1.0, %v203_v12 }
  0x81   :  { %v115_v18 = vsel %vm58_vm6, %v182_v17, 0.0 }
  0x82   :  { %116 = vadd.xlane.f32.xlu2 %v115_v18 }
  0x86   :  { %v50_v19 = vpop.f32.mrf.mxu0  ;;  %v53_v21 = vpop.f32.mrf.mxu1 }
  0x87   :  { %v56_v20 = vmul.f32 14.285714, %v50_v19  ;;  %v57_v23 = vmul.f32 14.285714, %v53_v21 }
  0x89   :  { %v59_v22 = vsel %vm58_vm6, %v56_v20, -inf  ;;  %v62_v24 = vsel %vm58_vm6, %v57_v23, -inf }
  0x8a   :  { %60 = vmax.xlane.f32.xlu0 %v59_v22 }
  0x92   :  { %63 = vmax.xlane.f32.xlu0 %v62_v24 }
  0xed   :  { %v114_v41 = vpop.xlane.xlu2 %113 }
  0xee   :  { %vm126_vm11 = vcmp.lt.f32.partialorder %v114_v41, 1e-06 }
  0xef   :  { %v128_v42 = vsel %vm126_vm11, 1.0, %v114_v41 }
  0xf0   :  { %vm143_vm13 = vweird.f32 %v128_v42  ;;  %v149_v52 = vand.u32 2147483648, %v128_v42  ;;  %v147_v54 = vand.u32 2147483647, %v128_v42 }
  0xf2   :  { %v150_v59 = vor.u32 1.1754944e-38, %v149_v52  ;;  %vm148_vm0 = vcmp.eq.f32.partialorder %v147_v54, 8.507059e+37 }
  0xf5   :  { %v117_v43 = vpop.xlane.xlu2 %116 }
  0xf6   :  { %vm127_vm12 = vcmp.lt.f32.partialorder %v117_v43, 1e-06 }
  0xf7   :  { %v129_v44 = vsel %vm127_vm12, 1.0, %v117_v43 }
  0xf8   :  { %vm158_vm1 = vweird.f32 %v129_v44  ;;  %v164_v1 = vand.u32 2147483648, %v129_v44  ;;  %v162_v4 = vand.u32 2147483647, %v129_v44 }
  0xfa   :  { %v165_v9 = vor.u32 1.1754944e-38, %v164_v1  ;;  %vm163_vm5 = vcmp.eq.f32.partialorder %v162_v4, 8.507059e+37 }
  0xfd   :  { %v61_v25 = vpop.xlane.xlu0 %60 }
  0xfe   :  { %v65_v26 = vsub.f32 %v56_v20, %v61_v25 }
 0x100   :  { %v100_v27 = vmul.f32 1.442695, %v65_v26  ;;  %v118_v28 = vmul.f32 %v181_v13, %v65_v26 }
 0x102   :  { %190 = vpow2.f32 %v100_v27  ;;  %v120_v29 = vsel %vm58_vm6, %v118_v28, 0.0 }
 0x103   :  { %121 = vadd.xlane.f32.xlu2 %v120_v29 }
 0x105   :  { %v64_v30 = vpop.xlane.xlu0 %63 }
 0x106   :  { %v66_v31 = vsub.f32 %v57_v23, %v64_v30 }
 0x108   :  { %v191_v32 = vpop.eup %190  ;;  %v102_v33 = vmul.f32 1.442695, %v66_v31  ;;  %v119_v36 = vmul.f32 %v182_v17, %v66_v31 }
 0x109   :  { %v104_v34 = vsel %vm239_vm4, %v191_v32, 0.0  ;;  %vm170_vm4 = vcmask 7168  }
 0x10a   :  { %192 = vpow2.f32 %v102_v33  ;;  %v106_v35 = vsel %vm58_vm6, %v104_v34, 0.0  ;;  %v123_v40 = vsel %vm58_vm6, %v119_v36, 0.0 }
 0x10b   :  { %107 = vadd.xlane.f32.xlu0 %v106_v35  ;;  %194 = vrcp.f32 %v128_v42 }
 0x10c   :  { %196 = vrcp.f32 %v129_v44 }
 0x110   :  { %v193_v37 = vpop.eup %192 }
 0x111   :  { %v105_v38 = vsel %vm246_vm8, %v193_v37, 0.0  ;;  %v195_v45 = vpop.eup %194 }
 0x112   :  { %v109_v39 = vsel %vm58_vm6, %v105_v38, 0.0  ;;  %v139_v46 = vmul.f32 %v195_v45, %v128_v42  ;;  %v197_v48 = vpop.eup %196  ;;  %vm144_vm14 = vweird.f32 %v195_v45 }
 0x113   :  { %110 = vadd.xlane.f32.xlu1 %v109_v39  ;;  %124 = vadd.xlane.f32.xlu0 %v123_v40  ;;  %v154_v51 = vmul.f32 %v197_v48, %v129_v44  ;;  %vm145_vm15 = vmor %vm143_vm13, %vm144_vm14  ;;  %vm159_vm2 = vweird.f32 %v197_v48 }
 0x114   :  { %v140_v47 = vsub.f32 1.0, %v139_v46  ;;  %vm160_vm3 = vmor %vm158_vm1, %vm159_vm2 }
 0x115   :  { %v155_v55 = vsub.f32 1.0, %v154_v51 }
 0x116   :  { %v141_v50 = vmul.f32 %v195_v45, %v140_v47 }
 0x117   :  { %v156_v60 = vmul.f32 %v197_v48, %v155_v55 }
 0x118   :  { %v142_v53 = vadd.f32 %v195_v45, %v141_v50 }
 0x119   :  { %v157_v3 = vadd.f32 %v197_v48, %v156_v60 }
 0x11a   :  { %v146_v62 = vsel %vm145_vm15, %v195_v45, %v142_v53 }
 0x11b   :  { %v151_v2 = vsel %vm148_vm0, %v150_v59, %v146_v62  ;;  %v161_v10 = vsel %vm160_vm3, %v197_v48, %v157_v3 }
 0x11c   :  { %v166_v14 = vsel %vm163_vm5, %v165_v9, %v161_v10 }
 0x176   :  { %v122_v63 = vpop.xlane.xlu2 %121 }
 0x17e   :  { %v108_v49 = vpop.xlane.xlu0 %107 }
 0x17f   :  { %198 = vlog2.f32 %v108_v49 }
 0x185   :  { %v199_v56 = vpop.eup %198 }
 0x186   :  { %v131_v57 = vmul.f32 0.6931472, %v199_v56  ;;  %v111_v58 = vpop.xlane.xlu1 %110  ;;  %v125_v12 = vpop.xlane.xlu0 %124 }
 0x187   :  { %200 = vlog2.f32 %v111_v58 }
 0x188   :  { %v134_v61 = vmul.f32 %v131_v57, %v114_v41 }
 0x18a   :  { %v136_v0 = vsub.f32 %v122_v63, %v134_v61 }
 0x18c   :  { %v152_v5 = vmul.f32 %v151_v2, %v136_v0 }
 0x18d   :  { %v201_v6 = vpop.eup %200 }
 0x18e   :  { %v168_v7 = vmul.f32 -1.0, %v152_v5  ;;  %v133_v8 = vmul.f32 0.6931472, %v201_v6 }
 0x190   :  { %171 = vst.msk [vmem:[%s272_s3] sm:$0xff] %vm170_vm4, %v168_v7  ;;  %v135_v11 = vmul.f32 %v133_v8, %v117_v43 }
 0x192   :  { %v137_v13 = vsub.f32 %v125_v12, %v135_v11 }
 0x194   :  { %v167_v15 = vmul.f32 %v166_v14, %v137_v13 }
 0x196   :  { %v169_v16 = vmul.f32 -1.0, %v167_v15 }
 0x198   :  { %172 = vst.msk [vmem:[%s272_s3 + $0x8] sm:$0xff] %vm170_vm4, %v169_v16 }

</bundles_post_ra>
